<compile_context>
chip_gen: v7x
topology: tpu7x:2x2x1
jax: 0.10.0
libtpu: 0.0.40
codegen_flags: <defaults>
</compile_context>

<pallas_src>
import jax
import jax.numpy as jnp
from jax.experimental import pallas as pl
from jax.experimental.pallas import tpu as pltpu


def _make_ncf_kernel(num_mlp_layers: int):
    """Fused NCF forward kernel in (feature, batch) layout.

    Ref layout:
      mf_u_ref : (mf_dim, TILE_B)
      mf_i_ref : (mf_dim, TILE_B)
      mlp_ref  : (layers[0], TILE_B)
      then per MLP layer: W_l (out, in), b_l (out, 1)
      then wp_gmf (mf_dim, 1), wp_mlp (layers[-1], 1), bp (1, 1)
      out_ref  : (1, TILE_B)
    """

    def kernel(mf_u_ref, mf_i_ref, mlp_ref, *refs):
        out_ref = refs[-1]
        wp_gmf = refs[-4][...]
        wp_mlp = refs[-3][...]
        bp = refs[-2][...]

        # ---- MLP tower: x <- relu(W @ x + b); batch on the lane axis so the
        #      MXU output width N == TILE_B (lane-dense). ----
        x = mlp_ref[...]
        for l in range(num_mlp_layers):
            w = refs[2 * l][...]        # (out, in)
            b = refs[2 * l + 1][...]    # (out, 1) broadcast over lanes
            x = jnp.maximum(
                jnp.dot(w, x, preferred_element_type=jnp.float32) + b, 0.0
            )

        # ---- GMF tower: elementwise product of MF latents (lane-dense VPU). ----
        gmf = mf_u_ref[...] * mf_i_ref[...]

        # ---- predict_layer: Linear(mf_dim + layers[-1], 1) on the concat.
        #      concat([gmf, mlp]) @ Wp == sum(gmf * Wp_gmf) + sum(mlp * Wp_mlp).
        #      Done as VPU multiply + sublane reduce (avoids N=1 MXU matmuls). ----
        logit = (
            jnp.sum(gmf * wp_gmf, axis=0, keepdims=True)
            + jnp.sum(x * wp_mlp, axis=0, keepdims=True)
            + bp
        )                               # (1, TILE_B)

        # binary_classification=True -> sigmoid; lane-dense unmasked store.
        out_ref[...] = jax.nn.sigmoid(logit)

    return kernel


def ncf_forward_pallas(mf_user, mf_item, mlp_vec, mlp_params, wp_gmf, wp_mlp, bp,
                       *, tile_b: int = 512):
    """Runs the fused NCF forward Pallas kernel.

    Args:
      mf_user:  (B, mf_dim) float32 MF user latents.
      mf_item:  (B, mf_dim) float32 MF item latents.
      mlp_vec:  (B, layers[0]) float32 concatenated MLP user/item latents.
      mlp_params: list of (W_in_out, b_1_out) tuples per MLP layer
                  (W stored (in, out), bias (1, out), as in the reference).
      wp_gmf:   (mf_dim, 1) predict-layer weight slice acting on GMF output.
      wp_mlp:   (layers[-1], 1) predict-layer weight slice acting on MLP output.
      bp:       (1, 1) predict-layer bias.
      tile_b:   batch tile (rounded to a multiple of 128).

    Returns:
      (B, 1) float32 sigmoid predictions.
    """
    B, mf_dim = mf_user.shape
    d_mlp_in = mlp_vec.shape[1]
    d_mlp_out = mlp_params[-1][0].shape[1]
    num_layers = len(mlp_params)

    # Batch tile sits on the lane axis -> multiple of 128; don't over-pad tiny B.
    tile_b = max(128, (int(tile_b) // 128) * 128)
    tile_b = min(tile_b, ((B + 127) // 128) * 128)
    num_tiles = pl.cdiv(B, tile_b)
    b_pad = num_tiles * tile_b

    def to_fb(a):
        # (B, F) -> (F, B_pad): feature-major, batch on lanes, zero-padded tail.
        a_t = jnp.asarray(a, jnp.float32).T
        if b_pad != B:
            a_t = jnp.pad(a_t, ((0, 0), (0, b_pad - B)))
        return a_t

    mf_u_t = to_fb(mf_user)
    mf_i_t = to_fb(mf_item)
    mlp_t = to_fb(mlp_vec)

    # Re-lay-out weights for the transposed kernel: W -> (out, in), b -> (out, 1).
    flat_params = []
    for w, b in mlp_params:
        flat_params.append(jnp.asarray(w, jnp.float32).T)
        flat_params.append(jnp.asarray(b, jnp.float32).reshape(1, -1).T)
    flat_params += [
        jnp.asarray(wp_gmf, jnp.float32).reshape(-1, 1),
        jnp.asarray(wp_mlp, jnp.float32).reshape(-1, 1),
        jnp.asarray(bp, jnp.float32).reshape(1, 1),
    ]

    def act_spec(feat):
        return pl.BlockSpec((feat, tile_b), lambda i: (0, i))

    def const_spec(p):
        # Full-array block, same block index every grid step -> DMA'd once,
        # stays VMEM-resident across all batch tiles.
        return pl.BlockSpec(p.shape, lambda i: (0, 0))

    in_specs = [act_spec(mf_dim), act_spec(mf_dim), act_spec(d_mlp_in)]
    in_specs += [const_spec(p) for p in flat_params]
    out_spec = pl.BlockSpec((1, tile_b), lambda i: (0, i))

    # Advisory cost hint so XLA can schedule/overlap the surrounding gathers.
    mm_flops = sum(2 * w.shape[0] * w.shape[1] for w, _ in mlp_params)
    flops = b_pad * (mm_flops + 2 * (mf_dim + d_mlp_out) + mf_dim)
    bytes_accessed = 4 * (
        b_pad * (2 * mf_dim + d_mlp_in + 1) + sum(int(p.size) for p in flat_params)
    )
    cost = pl.CostEstimate(
        flops=int(flops), transcendentals=int(b_pad),
        bytes_accessed=int(bytes_accessed),
    )

    out_t = pl.pallas_call(
        _make_ncf_kernel(num_layers),
        out_shape=jax.ShapeDtypeStruct((1, b_pad), jnp.float32),
        grid=(num_tiles,),
        in_specs=in_specs,
        out_specs=out_spec,
        compiler_params=pltpu.CompilerParams(
            dimension_semantics=("parallel",),          # 2x on v7x's 2 TCs
            vmem_limit_bytes=32 * 1024 * 1024,          # safe on v5e/v6e/v7x
        ),
        cost_estimate=cost,
    )(mf_u_t, mf_i_t, mlp_t, *flat_params)

    return out_t[:, :B].T   # back to (B, 1)


def init_ncf_params(key, num_users, num_items, mf_dim, layers):
    """Deterministic synthetic parameter init mirroring the module's shapes."""
    keys = jax.random.split(key, 6 + 2 * (len(layers) - 1) + 2)
    k = iter(keys)

    params = {}
    params["mf_user_emb"] = 0.1 * jax.random.normal(next(k), (num_users, mf_dim), jnp.float32)
    params["mf_item_emb"] = 0.1 * jax.random.normal(next(k), (num_items, mf_dim), jnp.float32)
    half = layers[0] // 2
    params["mlp_user_emb"] = 0.1 * jax.random.normal(next(k), (num_users, half), jnp.float32)
    params["mlp_item_emb"] = 0.1 * jax.random.normal(next(k), (num_items, half), jnp.float32)

    mlp_params = []
    for i in range(len(layers) - 1):
        fan_in, fan_out = layers[i], layers[i + 1]
        w = 0.1 * jax.random.normal(next(k), (fan_in, fan_out), jnp.float32)  # (in, out)
        b = 0.1 * jax.random.normal(next(k), (1, fan_out), jnp.float32)
        mlp_params.append((w, b))
    params["mlp"] = mlp_params

    wp = 0.1 * jax.random.normal(next(k), (mf_dim + layers[-1], 1), jnp.float32)
    params["wp_gmf"] = wp[:mf_dim, :]
    params["wp_mlp"] = wp[mf_dim:, :]
    params["bp"] = 0.1 * jax.random.normal(next(k), (1, 1), jnp.float32)
    return params


def ncf_reference(params, user_ids, item_ids):
    """Pure-JAX reference for correctness check."""
    mf_u = params["mf_user_emb"][user_ids]
    mf_i = params["mf_item_emb"][item_ids]
    mlp_u = params["mlp_user_emb"][user_ids]
    mlp_i = params["mlp_item_emb"][item_ids]
    x = jnp.concatenate([mlp_u, mlp_i], axis=-1)
    for w, b in params["mlp"]:
        x = jnp.maximum(x @ w + b, 0.0)
    gmf = mf_u * mf_i
    pv = jnp.concatenate([gmf, x], axis=-1)
    wp = jnp.concatenate([params["wp_gmf"], params["wp_mlp"]], axis=0)
    logit = pv @ wp + params["bp"]
    return jax.nn.sigmoid(logit)


if __name__ == "__main__":
    num_users, num_items = 32, 48
    mf_dim = 8
    layers = [32, 16, 8]   # layers[0] = MLP input dim, layers[-1] = MLP output dim

    key = jax.random.PRNGKey(0)
    pkey, ukey, ikey = jax.random.split(key, 3)
    params = init_ncf_params(pkey, num_users, num_items, mf_dim, layers)

    def run_case(batch, id_key, tile_b):
        uk, ik = jax.random.split(id_key, 2)
        user_ids = jax.random.randint(uk, (batch,), 0, num_users)
        item_ids = jax.random.randint(ik, (batch,), 0, num_items)

        # Glue: embedding gathers + MLP-vector concat in plain JAX.
        mf_user = params["mf_user_emb"][user_ids]
        mf_item = params["mf_item_emb"][item_ids]
        mlp_vec = jnp.concatenate(
            [params["mlp_user_emb"][user_ids], params["mlp_item_emb"][item_ids]],
            axis=-1,
        )

        pred = ncf_forward_pallas(
            mf_user, mf_item, mlp_vec,
            params["mlp"], params["wp_gmf"], params["wp_mlp"], params["bp"],
            tile_b=tile_b,
        )
        pred = jax.block_until_ready(pred)

        ref = ncf_reference(params, user_ids, item_ids)
        assert pred.shape == (batch, 1), pred.shape
        assert jnp.allclose(pred, ref, atol=1e-5, rtol=1e-5), (pred, ref)

    # Tiny batch (single padded tile) and a multi-tile grid with a ragged tail.
    run_case(8, ukey, tile_b=512)
    run_case(300, ikey, tile_b=128)

    print("KERNEL_OK")
</pallas_src>

<mosaic_0001>
module attributes {stable_mosaic.version = 11 : i64} {
  func.func @kernel(%arg0: i32, %arg1: memref<8x128xf32, #tpu.memory_space<vmem>>, %arg2: memref<8x128xf32, #tpu.memory_space<vmem>>, %arg3: memref<32x128xf32, #tpu.memory_space<vmem>>, %arg4: memref<16x32xf32, #tpu.memory_space<vmem>>, %arg5: memref<16x1xf32, #tpu.memory_space<vmem>>, %arg6: memref<8x16xf32, #tpu.memory_space<vmem>>, %arg7: memref<8x1xf32, #tpu.memory_space<vmem>>, %arg8: memref<8x1xf32, #tpu.memory_space<vmem>>, %arg9: memref<8x1xf32, #tpu.memory_space<vmem>>, %arg10: memref<1x1xf32, #tpu.memory_space<vmem>>, %arg11: memref<1x128xf32, #tpu.memory_space<vmem>>) attributes {dimension_semantics = [#tpu.dimension_semantics<parallel>], iteration_bounds = array<i64: 1>, scalar_prefetch = 0 : i64, scratch_operands = 0 : i64, tpu.core_type = #tpu.core_type<tc>, window_params = [{transform_indices = @transform_0, window_bounds = array<i64: 8, 128>}, {transform_indices = @transform_1, window_bounds = array<i64: 8, 128>}, {transform_indices = @transform_2, window_bounds = array<i64: 32, 128>}, {pipeline_mode = #tpu.pipeline_mode<synchronous>, transform_indices = @transform_3, window_bounds = array<i64: 16, 32>}, {pipeline_mode = #tpu.pipeline_mode<synchronous>, transform_indices = @transform_4, window_bounds = array<i64: 16, 1>}, {pipeline_mode = #tpu.pipeline_mode<synchronous>, transform_indices = @transform_5, window_bounds = array<i64: 8, 16>}, {pipeline_mode = #tpu.pipeline_mode<synchronous>, transform_indices = @transform_6, window_bounds = array<i64: 8, 1>}, {pipeline_mode = #tpu.pipeline_mode<synchronous>, transform_indices = @transform_7, window_bounds = array<i64: 8, 1>}, {pipeline_mode = #tpu.pipeline_mode<synchronous>, transform_indices = @transform_8, window_bounds = array<i64: 8, 1>}, {pipeline_mode = #tpu.pipeline_mode<synchronous>, transform_indices = @transform_9, window_bounds = array<i64: 1, 1>}, {transform_indices = @transform_10, window_bounds = array<i64: 1, 128>}]} {
    %c0 = arith.constant 0 : index
    %c0_0 = arith.constant 0 : index
    %0 = vector.load %arg8[%c0, %c0_0] : memref<8x1xf32, #tpu.memory_space<vmem>>, vector<8x1xf32>
    %c0_1 = arith.constant 0 : index
    %c0_2 = arith.constant 0 : index
    %1 = vector.load %arg9[%c0_1, %c0_2] : memref<8x1xf32, #tpu.memory_space<vmem>>, vector<8x1xf32>
    %c0_3 = arith.constant 0 : index
    %c0_4 = arith.constant 0 : index
    %2 = vector.load %arg10[%c0_3, %c0_4] : memref<1x1xf32, #tpu.memory_space<vmem>>, vector<1x1xf32>
    %c0_5 = arith.constant 0 : index
    %c0_6 = arith.constant 0 : index
    %3 = vector.load %arg3[%c0_5, %c0_6] : memref<32x128xf32, #tpu.memory_space<vmem>>, vector<32x128xf32>
    %c0_7 = arith.constant 0 : index
    %c0_8 = arith.constant 0 : index
    %4 = vector.load %arg4[%c0_7, %c0_8] : memref<16x32xf32, #tpu.memory_space<vmem>>, vector<16x32xf32>
    %c0_9 = arith.constant 0 : index
    %c0_10 = arith.constant 0 : index
    %5 = vector.load %arg5[%c0_9, %c0_10] : memref<16x1xf32, #tpu.memory_space<vmem>>, vector<16x1xf32>
    %cst = arith.constant dense<0.000000e+00> : vector<16x128xf32>
    %6 = tpu.matmul %4, %3, %cst {dimension_numbers = #tpu.dot_dimension_numbers<[1], [0], [0], [1], [0, 0, 1, 1], [], []>} : vector<16x32xf32>, vector<32x128xf32>, vector<16x128xf32> -> vector<16x128xf32>
    %7 = vector.broadcast %5 : vector<16x1xf32> to vector<16x128xf32>
    %8 = arith.addf %6, %7 : vector<16x128xf32>
    %cst_11 = arith.constant 0.000000e+00 : f32
    %9 = vector.broadcast %cst_11 : f32 to vector<16x128xf32>
    %10 = arith.maximumf %8, %9 : vector<16x128xf32>
    %c0_12 = arith.constant 0 : index
    %c0_13 = arith.constant 0 : index
    %11 = vector.load %arg6[%c0_12, %c0_13] : memref<8x16xf32, #tpu.memory_space<vmem>>, vector<8x16xf32>
    %c0_14 = arith.constant 0 : index
    %c0_15 = arith.constant 0 : index
    %12 = vector.load %arg7[%c0_14, %c0_15] : memref<8x1xf32, #tpu.memory_space<vmem>>, vector<8x1xf32>
    %cst_16 = arith.constant dense<0.000000e+00> : vector<8x128xf32>
    %13 = tpu.matmul %11, %10, %cst_16 {dimension_numbers = #tpu.dot_dimension_numbers<[1], [0], [0], [1], [0, 0, 1, 1], [], []>} : vector<8x16xf32>, vector<16x128xf32>, vector<8x128xf32> -> vector<8x128xf32>
    %14 = vector.broadcast %12 : vector<8x1xf32> to vector<8x128xf32>
    %15 = arith.addf %13, %14 : vector<8x128xf32>
    %cst_17 = arith.constant 0.000000e+00 : f32
    %16 = vector.broadcast %cst_17 : f32 to vector<8x128xf32>
    %17 = arith.maximumf %15, %16 : vector<8x128xf32>
    %c0_18 = arith.constant 0 : index
    %c0_19 = arith.constant 0 : index
    %18 = vector.load %arg1[%c0_18, %c0_19] : memref<8x128xf32, #tpu.memory_space<vmem>>, vector<8x128xf32>
    %c0_20 = arith.constant 0 : index
    %c0_21 = arith.constant 0 : index
    %19 = vector.load %arg2[%c0_20, %c0_21] : memref<8x128xf32, #tpu.memory_space<vmem>>, vector<8x128xf32>
    %20 = arith.mulf %18, %19 : vector<8x128xf32>
    %21 = vector.broadcast %0 : vector<8x1xf32> to vector<8x128xf32>
    %22 = arith.mulf %20, %21 : vector<8x128xf32>
    %cst_22 = arith.constant dense<0.000000e+00> : vector<128xf32>
    %23 = vector.multi_reduction <add>, %22, %cst_22 [0] : vector<8x128xf32> to vector<128xf32>
    %24 = vector.shape_cast %23 : vector<128xf32> to vector<1x128xf32>
    %25 = vector.broadcast %1 : vector<8x1xf32> to vector<8x128xf32>
    %26 = arith.mulf %17, %25 : vector<8x128xf32>
    %cst_23 = arith.constant dense<0.000000e+00> : vector<128xf32>
    %27 = vector.multi_reduction <add>, %26, %cst_23 [0] : vector<8x128xf32> to vector<128xf32>
    %28 = vector.shape_cast %27 : vector<128xf32> to vector<1x128xf32>
    %29 = arith.addf %24, %28 : vector<1x128xf32>
    %30 = vector.broadcast %2 : vector<1x1xf32> to vector<1x128xf32>
    %31 = arith.addf %29, %30 : vector<1x128xf32>
    %32 = arith.negf %31 : vector<1x128xf32>
    %33 = math.exp %32 : vector<1x128xf32>
    %cst_24 = arith.constant 1.000000e+00 : f32
    %34 = vector.broadcast %cst_24 : f32 to vector<1x128xf32>
    %35 = arith.addf %34, %33 : vector<1x128xf32>
    %36 = arith.divf %34, %35 : vector<1x128xf32>
    %c0_25 = arith.constant 0 : index
    %c0_26 = arith.constant 0 : index
    %37 = vector.load %arg11[%c0_25, %c0_26] : memref<1x128xf32, #tpu.memory_space<vmem>>, vector<1x128xf32>
    tpu.vector_store %arg11[%c0_25, %c0_26], %36 {strides = array<i32>} : memref<1x128xf32, #tpu.memory_space<vmem>>, vector<1x128xf32>,
    return
  }
  func.func @transform_0(%arg0: i32) -> (i32, i32) {
    %c0_i32 = arith.constant 0 : i32
    %c0_i32_0 = arith.constant 0 : i32
    return %c0_i32, %arg0 : i32, i32
  }
  func.func @transform_1(%arg0: i32) -> (i32, i32) {
    %c0_i32 = arith.constant 0 : i32
    %c0_i32_0 = arith.constant 0 : i32
    return %c0_i32, %arg0 : i32, i32
  }
  func.func @transform_2(%arg0: i32) -> (i32, i32) {
    %c0_i32 = arith.constant 0 : i32
    %c0_i32_0 = arith.constant 0 : i32
    return %c0_i32, %arg0 : i32, i32
  }
  func.func @transform_3(%arg0: i32) -> (i32, i32) {
    %c0_i32 = arith.constant 0 : i32
    %c0_i32_0 = arith.constant 0 : i32
    %c0_i32_1 = arith.constant 0 : i32
    return %c0_i32, %c0_i32_0 : i32, i32
  }
  func.func @transform_4(%arg0: i32) -> (i32, i32) {
    %c0_i32 = arith.constant 0 : i32
    %c0_i32_0 = arith.constant 0 : i32
    %c0_i32_1 = arith.constant 0 : i32
    return %c0_i32, %c0_i32_0 : i32, i32
  }
  func.func @transform_5(%arg0: i32) -> (i32, i32) {
    %c0_i32 = arith.constant 0 : i32
    %c0_i32_0 = arith.constant 0 : i32
    %c0_i32_1 = arith.constant 0 : i32
    return %c0_i32, %c0_i32_0 : i32, i32
  }
  func.func @transform_6(%arg0: i32) -> (i32, i32) {
    %c0_i32 = arith.constant 0 : i32
    %c0_i32_0 = arith.constant 0 : i32
    %c0_i32_1 = arith.constant 0 : i32
    return %c0_i32, %c0_i32_0 : i32, i32
  }
  func.func @transform_7(%arg0: i32) -> (i32, i32) {
    %c0_i32 = arith.constant 0 : i32
    %c0_i32_0 = arith.constant 0 : i32
    %c0_i32_1 = arith.constant 0 : i32
    return %c0_i32, %c0_i32_0 : i32, i32
  }
  func.func @transform_8(%arg0: i32) -> (i32, i32) {
    %c0_i32 = arith.constant 0 : i32
    %c0_i32_0 = arith.constant 0 : i32
    %c0_i32_1 = arith.constant 0 : i32
    return %c0_i32, %c0_i32_0 : i32, i32
  }
  func.func @transform_9(%arg0: i32) -> (i32, i32) {
    %c0_i32 = arith.constant 0 : i32
    %c0_i32_0 = arith.constant 0 : i32
    %c0_i32_1 = arith.constant 0 : i32
    return %c0_i32, %c0_i32_0 : i32, i32
  }
  func.func @transform_10(%arg0: i32) -> (i32, i32) {
    %c0_i32 = arith.constant 0 : i32
    %c0_i32_0 = arith.constant 0 : i32
    return %c0_i32, %arg0 : i32, i32
  }
}

</mosaic_0001>

<bundles_post_ra>
// kernel: tpu_custom_call.1
= control target key start
LH: loop header
LB: loop body
LE: loop exit
PB: predicated region body
PF: predicated region fallthrough
CT: control target
= control target key end

     0   :  { %s576_s0 = inlined_call_operand.hbm [shape: f32[8,128], index: 0, kind: input, shape index: {}]   ;;  %s577_s1 = inlined_call_operand.hbm [shape: f32[8,128], index: 1, kind: input, shape index: {}]   ;;  %s578_s2 = inlined_call_operand.vmem [shape: f32[32,128], index: 2, kind: input, shape index: {}]   ;;  %s579_s3 = inlined_call_operand.vmem [shape: f32[16,32], index: 3, kind: input, shape index: {}]   ;;  %s580_s4 = inlined_call_operand.vmem [shape: f32[16,1], index: 4, kind: input, shape index: {}]   ;;  %s581_s5 = inlined_call_operand.vmem [shape: f32[8,16], index: 5, kind: input, shape index: {}]   ;;  %s582_s6 = inlined_call_operand.vmem [shape: f32[8,1], index: 6, kind: input, shape index: {}]   ;;  %s583_s7 = inlined_call_operand.vmem [shape: f32[8,1], index: 7, kind: input, shape index: {}]   ;;  %s584_s8 = inlined_call_operand.vmem [shape: f32[8,1], index: 8, kind: input, shape index: {}]   ;;  %s585_s9 = inlined_call_operand.<no memory space> [shape: f32[1,1], index: 9, kind: input, shape index: {}]   ;;  %s586_s10 = inlined_call_operand.hbm [shape: f32[1,128], index: 10, kind: output, shape index: {}]  }
   0x1   :  { %v15_v0 = vstv %s585_s9 }
   0x2   :  { %16 = vst [vmem:[#allocation2] sm:$0x1] %v15_v0 }
   0x3   :  { %17 = vsyncpa [#allocation4], 0 }
   0x4   :  { %18 = vsyncpa [#allocation7], 0 }
   0x5   :  { %19 = vsyncpa [#allocation5], 0  ;;  %s437_s15 = smov [#allocation3]   ;;  %s438_s17 = smov [#allocation6]  }
   0x6   :  { %s26_s16 = sshll.u32 %s437_s15, 4  ;;  %s36_s18 = sshll.u32 %s438_s17, 4  ;;  %s27_s16 = int_to_ptr.vmem [resolvable:$true] %s26_s16  ;;  %s37_s18 = int_to_ptr.vmem [resolvable:$true] %s36_s18 }
   0x7   :  { %s365_s21 = scalar_lea.hbm %s576_s0, 128 }
   0x8   :  { %p366_p0 = scmp.ne.s32.totalorder %s576_s0, %s365_s21  ;;  %p369_p1 = scmp.lt.u32.totalorder %s365_s21, %s576_s0 }
   0xa   :  { %p371_p2 = pnand %p369_p1, %p366_p0 }
   0xc   :  { %374 = shalt.err (!%p371_p2)
}
   0xd   :  { %s375_s25 = scalar_lea.vmem %s27_s16, 128  ;;  %p380_p4 = scmp.lt.s32.totalorder %s27_s16, %s27_s16 }
   0xe   :  { %p376_p3 = scmp.ne.s32.totalorder %s27_s16, %s375_s25  ;;  %p381_p5 = scmp.lt.s32.totalorder %s375_s25, %s375_s25 }
  0x10   :  { %p382_p6 = por %p381_p5, %p380_p4 }
  0x12   :  { %p383_p7 = pnand %p382_p6, %p376_p3 }
  0x14   :  { %386 = shalt.err (!%p383_p7)
}
  0x15   :  { %29 = dma.hbm_to_vmem [thread:$0]  %s576_s0, 128, %s27_s16, [#allocation4]  }
  0x16   :  { %s387_s30 = scalar_lea.hbm %s577_s1, 128 }
  0x17   :  { %p388_p8 = scmp.ne.s32.totalorder %s577_s1, %s387_s30  ;;  %p391_p9 = scmp.lt.u32.totalorder %s387_s30, %s577_s1 }
  0x19   :  { %p393_p10 = pnand %p391_p9, %p388_p8 }
  0x1b   :  { %396 = shalt.err (!%p393_p10)
}
  0x1c   :  { %s397_s15 = scalar_lea.vmem %s37_s18, 128  ;;  %p402_p12 = scmp.lt.s32.totalorder %s37_s18, %s37_s18 }
  0x1d   :  { %p398_p11 = scmp.ne.s32.totalorder %s37_s18, %s397_s15  ;;  %p403_p13 = scmp.lt.s32.totalorder %s397_s15, %s397_s15 }
  0x1f   :  { %p404_p0 = por %p403_p13, %p402_p12 }
  0x21   :  { %p405_p1 = pnand %p404_p0, %p398_p11 }
  0x23   :  { %408 = shalt.err (!%p405_p1)
}
  0x24   :  { %39 = dma.hbm_to_vmem [thread:$0]  %s577_s1, 128, %s37_s18, [#allocation7]  }
  0x25   :  { %431 = dma.done.wait [#allocation4], 128  }
  0x26   :  { %432 = vsyncadd [#allocation4], 4294967168 }
  0x27   :  { %433 = dma.done.wait [#allocation7], 128  }
  0x28   :  { %434 = vsyncadd [#allocation7], 4294967168  ;;  %v439_v1 = vmov 0   ;;  %vm83_vm0 = vcmask 261120   ;;  %v65_v2 = vld [vmem:[%s578_s2] sm:$0xff]  ;;  %v66_v3 = vld [vmem:[%s578_s2 + $0x8] sm:$0xff]  ;;  %v282_v44 = vlaneseq }
  0x29   :  { %359 = vset.pattern.permute.xlu0 %v439_v1  ;;  %360 = vset.pattern.permute.xlu1 %v439_v1  ;;  %v67_v4 = vld [vmem:[%s578_s2 + $0x10] sm:$0xff]  ;;  %v341_v5 = vpack.c.bf16 %v66_v3, %v65_v2  ;;  %v68_v6 = vld [vmem:[%s578_s2 + $0x18] sm:$0xff]  ;;  %v69_v7 = vld [vmem:[%s579_s3] sm:$0xff]  ;;  %v440_v13 = vmov 0.0|0.0   ;;  %vm441_vm1 = vmmov 0   ;;  %v442_v14 = vmov 0.0  }
  0x2a   :  { %v345_v8 = vpack.c.bf16 %v68_v6, %v67_v4  ;;  %331 = vmatprep.mubr.msk.f32.mxu0 %vm83_vm0, %v69_v7  ;;  %v71_v9 = vld [vmem:[%s580_s4] sm:$0xff]  ;;  %v72_v10 = vld [vmem:[%s580_s4 + $0x8] sm:$0xff]  ;;  %349 = vmatprep.subr.bf16.mxu1 %v440_v13  ;;  %vm174_vm2 = vcmask 130048   ;;  %v283_v48 = vshrl.u32 %v282_v44, 7 }
  0x2b   :  { %342 = vmatprep.subr.bf16.mxu0 %v341_v5  ;;  %75 = vperm.xlu0 %359, %v71_v9   ;;  %v70_v11 = vld [vmem:[%s579_s3 + $0x8] sm:$0xff]  ;;  %v63_v12 = vld [vmem:[%s584_s8] sm:$0xff] }
  0x2c   :  { %344 = vmatpush3.bf16.msra.mxu0 %v341_v5  ;;  %338 = vmatprep.mubr.msk.f32.mxu1 %vm441_vm1, %v442_v14  ;;  %v168_v15 = vld [vmem:[%s582_s6] sm:$0xff]  ;;  %v250_v30 = vld [vmem:[#allocation6] sm:$0xff]  ;;  %v284_v52 = vsub.s32 0, %v283_v48 }
  0x2d   :  { %346 = vmatprep.subr.bf16.mxu0 %v345_v8  ;;  %171 = vperm.xlu1 %360, %v168_v15   ;;  %v62_v16 = vld [vmem:[%s583_s7] sm:$0xff] }
  0x2e   :  { %v64_v17 = vld [vmem:[#allocation2] sm:$0x1]  ;;  %v249_v29 = vld [vmem:[#allocation3] sm:$0xff] }
  0x2f   :  { %80 = vperm.xlu0 %359, %v72_v10   ;;  %v167_v27 = vld [vmem:[%s581_s5] sm:$0xff]  ;;  %v251_v31 = vmul.f32 %v250_v30, %v249_v29  ;;  %s443_s5 = smov [#allocation8]  }
  0x30   :  { %348 = vmatpush3.bf16.msra.mxu0 %v345_v8  ;;  %s300_s7 = sshll.u32 %s443_s5, 4  ;;  %s301_s7 = int_to_ptr.vmem [resolvable:$true] %s300_s7 }
  0x31   :  { %254 = vperm.xlu1 %360, %v62_v16   ;;  %s409_s8 = scalar_lea.vmem %s301_s7, 16  ;;  %s413_s15 = scalar_lea.vmem %s301_s7, 32 }
  0x32   :  { %p410_p2 = scmp.ne.s32.totalorder %s301_s7, %s409_s8  ;;  %p414_p3 = scmp.lt.s32.totalorder %s301_s7, %s301_s7 }
  0x33   :  { %332 = vmatmul.mubr.msk.f32.vlgmr.msra.gmra.mrb[0].mxu0 %vm83_vm0, %v70_v11  ;;  %266 = vperm.xlu0 %359, %v63_v12   ;;  %p415_p4 = scmp.lt.s32.totalorder %s413_s15, %s409_s8 }
  0x35   :  { %279 = vperm.xlu1 %360, %v64_v17   ;;  %p416_p5 = por %p415_p4, %p414_p3 }
  0x37   :  { %p417_p6 = pnand %p416_p5, %p410_p2 }
  0xaa   :  { %v76_v18 = vpop.permute.xlu0 %75 }
  0xac   :  { %v172_v28 = vpop.permute.xlu1 %171 }
  0xae   :  { %v81_v19 = vpop.permute.xlu0 %80 }
  0xb0   :  { %v255_v32 = vpop.permute.xlu1 %254 }
  0xb1   :  { %v257_v33 = vmul.f32 %v255_v32, %v251_v31 }
  0xb2   :  { %v267_v40 = vpop.permute.xlu0 %266 }
  0xb3   :  { %v258_v34 = vrot.slane %v257_v33, 4 }
  0xb4   :  { %v280_v53 = vpop.permute.xlu1 %279 }
  0xb5   :  { %v259_v36 = vadd.f32 %v258_v34, %v257_v33  ;;  %v285_v57 = vrot.slane %v280_v53, %v284_v52 }
  0xb7   :  { %v260_v41 = vrot.slane %v259_v36, 2 }
  0xb9   :  { %v261_v45 = vadd.f32 %v260_v41, %v259_v36 }
  0xbb   :  { %v262_v49 = vrot.slane %v261_v45, 1 }
  0xbd   :  { %v263_v54 = vadd.f32 %v262_v49, %v261_v45 }
 0x106   :  { %v333_v20 = vpop.f32.mrb[0].mxu0 }
 0x107   :  { %v162_v21 = vadd.f32 %v333_v20, %v81_v19  ;;  %v156_v22 = vpop.f32.mrb[1].mxu0 }
 0x108   :  { %v157_v23 = vadd.f32 %v156_v22, %v76_v18 }
 0x109   :  { %v166_v24 = vmax.f32 %v162_v21, 0.0 }
 0x10a   :  { %v165_v25 = vmax.f32 %v157_v23, 0.0 }
 0x10c   :  { %v350_v26 = vpack.c.bf16 %v166_v24, %v165_v25 }
 0x10e   :  { %351 = vmatpush3.bf16.msra.mxu1 %v350_v26 }
 0x111   :  { %339 = vmatmul.mubr.msk.f32.vlgmr.msra.gmra.mrb[0].mxu1 %vm174_vm2, %v167_v27 }
 0x1e4   :  { %v244_v35 = vpop.f32.mrb[0].mxu1 }
 0x1e5   :  { %v245_v37 = vadd.f32 %v244_v35, %v172_v28  ;;  %v340_v38 = vpop.f32.mrb[1].mxu1 }
 0x1e7   :  { %v248_v39 = vmax.f32 %v245_v37, 0.0 }
 0x1e9   :  { %v269_v42 = vmul.f32 %v267_v40, %v248_v39 }
 0x1eb   :  { %v270_v43 = vrot.slane %v269_v42, 4 }
 0x1ed   :  { %v271_v46 = vadd.f32 %v270_v43, %v269_v42 }
 0x1ef   :  { %v272_v47 = vrot.slane %v271_v46, 2 }
 0x1f1   :  { %v273_v50 = vadd.f32 %v272_v47, %v271_v46 }
 0x1f3   :  { %v274_v51 = vrot.slane %v273_v50, 1 }
 0x1f5   :  { %v275_v55 = vadd.f32 %v274_v51, %v273_v50 }
 0x1f7   :  { %v276_v56 = vadd.f32 %v275_v55, %v263_v54 }
 0x1f9   :  { %v286_v58 = vadd.f32 %v285_v57, %v276_v56 }
 0x1fb   :  { %v313_v59 = vmul.f32 -1.442695, %v286_v58 }
 0x1fd   :  { %361 = vpow2.f32 %v313_v59 }
 0x207   :  { %v362_v60 = vpop.eup %361 }
 0x208   :  { %v290_v61 = vadd.f32 1.0, %v362_v60 }
 0x20a   :  { %363 = vrcp.f32 %v290_v61 }
 0x214   :  { %v364_v62 = vpop.eup %363 }
 0x215   :  { %293 = vst [vmem:[#allocation8] sm:$0x1] %v364_v62 }
 0x216   :  { %420 = shalt.err (!%p417_p6)
}
 0x217   :  { %s421_s17 = scalar_lea.hbm %s586_s10, 16 }
 0x218   :  { %p422_p7 = scmp.ne.s32.totalorder %s586_s10, %s421_s17  ;;  %p425_p8 = scmp.lt.u32.totalorder %s421_s17, %s586_s10 }
 0x21a   :  { %p427_p9 = pnand %p425_p8, %p422_p7 }
 0x21c   :  { %430 = shalt.err (!%p427_p9)
}
 0x21d   :  { %303 = dma.vmem_to_hbm [thread:$0]  %s301_s7, 16, %s586_s10, [#allocation5]  }
 0x21e   :  { %435 = dma.done.wait [#allocation5], 16  }
 0x21f   :  { %436 = vsyncadd [#allocation5], 4294967280 }
 0x220   :  { %307 = vsyncpa [#allocation4], 1 }
 0x221   :  { %308 = vsyncpa [#allocation7], 1 }
 0x222   :  { %309 = vsyncpa [#allocation5], 1 }

</bundles_post_ra>
